<compile_context>
chip_gen: v5e
topology: v5e:2x2
jax: 0.10.0
libtpu: 0.0.40
codegen_flags: <defaults>
</compile_context>

<pallas_src>
import jax
import jax.numpy as jnp
from jax.experimental import pallas as pl
from jax.experimental.pallas import tpu as pltpu

LANES = 128
SUBLANES = 8


def onedlayer_kernel(x_ref, flag_ref, y_ref, x_out_ref):
    # x:    (1,)        f32  SMEM   (the parameter)
    # flag: (rows, 128) i32  VMEM   (1 where t % 101 == 1, else 0)
    # y:    (rows, 128) f32  VMEM   (lane-dense output)
    # x_out:(1,)        f32  SMEM   (clamped parameter, aliased onto x)

    # clamp the parameter once (scalar unit), write it back (in-place clamp).
    x = x_ref[0]
    x = jnp.minimum(x, jnp.float32(1.0))
    x = jnp.maximum(x, jnp.float32(-1.0))
    x_out_ref[0] = x

    # branch-select + scale on the VPU, whole lane-dense tile at once.
    flag = flag_ref[...]
    scale = jnp.where(flag != 0, jnp.float32(1010.0), jnp.float32(-10.0))
    y_ref[...] = x * scale


def onedlayer_forward(x, t):
    """Run oneDlayer.forward for one or many timesteps.

    x: parameter, shape (1,) float32.
    t: python int, or int array of timesteps (any shape).
    Returns (y, x_new):
      y      — float32, same shape as t  (the forward output per timestep)
      x_new  — float32 (1,)              (the clamped parameter, i.e. the new self.x)
    """
    x_arr = jnp.asarray(x, dtype=jnp.float32).reshape((1,))
    t_arr = jnp.asarray(t, dtype=jnp.int32)
    t_shape = t_arr.shape
    t_flat = t_arr.reshape((-1,))
    n = t_flat.shape[0]

    # pad to a lane-dense (rows, 128) tile, rows a multiple of 8 (one vreg per 8x128).
    tile = SUBLANES * LANES
    n_pad = ((n + tile - 1) // tile) * tile
    t_flat = jnp.pad(t_flat, (0, n_pad - n))

    # hoist the integer modulo out of the kernel (floor-mod, matches Python/PyTorch).
    flag = (t_flat % 101 == 1).astype(jnp.int32).reshape((-1, LANES))
    rows = flag.shape[0]

    y2d, x_new = pl.pallas_call(
        onedlayer_kernel,
        out_shape=(
            jax.ShapeDtypeStruct((rows, LANES), jnp.float32),  # y (lane-dense)
            jax.ShapeDtypeStruct((1,), jnp.float32),           # clamped parameter
        ),
        in_specs=[
            pl.BlockSpec(memory_space=pltpu.SMEM),   # x      (scalar parameter)
            pl.BlockSpec(memory_space=pltpu.VMEM),   # flag   (lane-dense)
        ],
        out_specs=(
            pl.BlockSpec(memory_space=pltpu.VMEM),   # y
            pl.BlockSpec(memory_space=pltpu.SMEM),   # x_new
        ),
        # reproduce PyTorch's in-place clamp: clamped x written over the parameter buffer.
        input_output_aliases={0: 1},
    )(x_arr, flag)

    y = y2d.reshape((-1,))[:n].reshape(t_shape)
    return y, x_new
    # TODO(synk): PyTorch re-binds self.x to a fresh nn.Parameter when clamping; here the
    # caller is expected to re-bind the parameter to the returned x_new (module-state
    # mutation itself has no Pallas equivalent).


if __name__ == "__main__":
    key = jax.random.PRNGKey(0)
    k1, k2 = jax.random.split(key)

    # deterministic parameter in [-2, 2] so the clamp is exercised sometimes
    x_param = jax.random.uniform(k1, (1,), dtype=jnp.float32, minval=-2.0, maxval=2.0)

    # a lane-dense batch of timesteps (8 * 128 = 1024) covering both branches
    t_batch = jax.random.randint(k2, (SUBLANES * LANES,), 0, 500, dtype=jnp.int32)
    t_batch = t_batch.at[0].set(102)  # t % 101 == 1  -> 1010 * x branch
    t_batch = t_batch.at[1].set(7)    # t % 101 != 1  -> -10 * x branch

    y, x_new = onedlayer_forward(x_param, t_batch)
    jax.block_until_ready((y, x_new))

    # reference (plain JAX)
    x_clamped = jnp.clip(x_param, -1.0, 1.0)
    scale_ref = jnp.where(t_batch % 101 == 1, 1010.0, -10.0).astype(jnp.float32)
    y_ref = x_clamped[0] * scale_ref
    assert jnp.allclose(y, y_ref), (y[:4], y_ref[:4])
    assert jnp.allclose(x_new, x_clamped), (x_new, x_clamped)

    # also exercise the single-timestep path (scalar t)
    y1, _ = onedlayer_forward(x_param, 102)
    y2, _ = onedlayer_forward(x_param, 7)
    jax.block_until_ready((y1, y2))
    assert jnp.allclose(y1, x_clamped[0] * 1010.0), (y1, x_clamped[0] * 1010.0)
    assert jnp.allclose(y2, x_clamped[0] * -10.0), (y2, x_clamped[0] * -10.0)

    print("KERNEL_OK")
</pallas_src>

<mosaic_0001>
module attributes {stable_mosaic.version = 11 : i64} {
  func.func @onedlayer_kernel(%arg0: memref<1xf32, #tpu.memory_space<smem>>, %arg1: memref<8x128xi32, #tpu.memory_space<vmem>>, %arg2: memref<8x128xf32, #tpu.memory_space<vmem>>, %arg3: memref<1xf32, #tpu.memory_space<smem>>) attributes {dimension_semantics = [], scalar_prefetch = 0 : i64, scratch_operands = 0 : i64, tpu.core_type = #tpu.core_type<tc>} {
    %c0 = arith.constant 0 : index
    %0 = memref.load %arg0[%c0] : memref<1xf32, #tpu.memory_space<smem>>
    %cst = arith.constant 1.000000e+00 : f32
    %1 = arith.minimumf %0, %cst : f32
    %cst_0 = arith.constant -1.000000e+00 : f32
    %2 = arith.maximumf %1, %cst_0 : f32
    %c0_1 = arith.constant 0 : index
    %3 = memref.load %arg3[%c0_1] : memref<1xf32, #tpu.memory_space<smem>>
    memref.store %2, %arg3[%c0_1] : memref<1xf32, #tpu.memory_space<smem>>
    %c0_2 = arith.constant 0 : index
    %c0_3 = arith.constant 0 : index
    %4 = vector.load %arg1[%c0_2, %c0_3] : memref<8x128xi32, #tpu.memory_space<vmem>>, vector<8x128xi32>
    %c0_i32 = arith.constant 0 : i32
    %5 = vector.broadcast %c0_i32 : i32 to vector<8x128xi32>
    %6 = arith.cmpi ne, %4, %5 : vector<8x128xi32>
    %cst_4 = arith.constant 1.010000e+03 : f32
    %cst_5 = arith.constant -1.000000e+01 : f32
    %7 = vector.broadcast %cst_4 : f32 to vector<8x128xf32>
    %8 = vector.broadcast %cst_5 : f32 to vector<8x128xf32>
    %9 = arith.select %6, %7, %8 : vector<8x128xi1>, vector<8x128xf32>
    %10 = vector.broadcast %2 : f32 to vector<8x128xf32>
    %11 = arith.mulf %10, %9 : vector<8x128xf32>
    %c0_6 = arith.constant 0 : index
    %c0_7 = arith.constant 0 : index
    %12 = vector.load %arg2[%c0_6, %c0_7] : memref<8x128xf32, #tpu.memory_space<vmem>>, vector<8x128xf32>
    tpu.vector_store %arg2[%c0_6, %c0_7], %11 {strides = array<i32>} : memref<8x128xf32, #tpu.memory_space<vmem>>, vector<8x128xf32>,
    return
  }
}

</mosaic_0001>

<bundles_post_ra>
// kernel: tpu_custom_call.1
= control target key start
LH: loop header
LB: loop body
LE: loop exit
PB: predicated region body
PF: predicated region fallthrough
CT: control target
= control target key end

     0   :  { %10 = vsyncpa [#allocation4], 0  ;;  %s183_s0 = inlined_call_operand.<no memory space> [shape: f32[1], index: 0, kind: input, shape index: {}, may-alias: {0,3}]   ;;  %s184_s1 = inlined_call_operand.hbm [shape: s32[8,128], index: 1, kind: input, shape index: {}]   ;;  %s185_s2 = inlined_call_operand.hbm [shape: f32[8,128], index: 2, kind: output, shape index: {0}]   ;;  %s186_s3 = inlined_call_operand.hbm [shape: f32[1], index: 3, kind: output, shape index: {1}, may-alias: {0,3}]  }
   0x1   :  { %11 = vsyncpa [#allocation5], 0 }
   0x2   :  { %12 = vsyncpa [#allocation6], 0  ;;  %s20_s14 = sshll.u32 %s184_s1, 4  ;;  %s145_s15 = smov [#allocation3]   ;;  %s21_s14 = int_to_ptr.hbm [resolvable:$true] %s20_s14 }
   0x3   :  { %s22_s16 = sshll.u32 %s145_s15, 4  ;;  %s23_s16 = int_to_ptr.vmem [resolvable:$true] %s22_s16 }
   0x4   :  { %25 = dma.hbm_to_vmem [thread:$0]  %s21_s14, 128, %s23_s16, [#allocation4]  }
   0x5   :  { %139 = dma.done.wait [#allocation4], 128  }
   0x6   :  { %140 = vsyncadd [#allocation4], 4294967168  ;;  %s146_s17 = smov 1.0   ;;  %s147_s21 = smov -1.0   ;;  %v35_v0 = vld [vmem:[#allocation3] sm:$0xff]  ;;  %v150_v2 = vmov -10.0  }
   0x7   :  { %s31_s20 = smin.f32 %s146_s17, %s183_s0  ;;  %s148_s23 = smov [#allocation7]   ;;  %vm36_vm0 = vcmp.ne.s32.totalorder %v35_v0, 0 }
   0x8   :  { %s32_s22 = smax.f32 %s147_s21, %s31_s20  ;;  %s46_s24 = sshll.u32 %s148_s23, 4  ;;  %v37_v3 = vsel %vm36_vm0, 1010.0, %v150_v2  ;;  %s47_s24 = int_to_ptr.vmem [resolvable:$true] %s46_s24 }
   0x9   :  { %34 = sst [smem:[#allocation8]] %s32_s22  ;;  %s57_s1 = sshll.u32 %s186_s3, 4  ;;  %v38_v1 = vstv %s32_s22  ;;  %s58_s1 = int_to_ptr.hbm [resolvable:$true] %s57_s1 }
   0xa   :  { %s48_s29 = sshll.u32 %s185_s2, 4  ;;  %s149_s30 = smov [#allocation8]   ;;  %v39_v4 = vmul.f32 %v38_v1, %v37_v3  ;;  %s49_s29 = int_to_ptr.hbm [resolvable:$true] %s48_s29 }
   0xb   :  { %60 = dma.smem_to_hbm %s149_s30, 16, %s58_s1, [#allocation6]  }
   0xc   :  { %40 = vst [vmem:[#allocation7] sm:$0xff] %v39_v4 }
   0xd   :  { %51 = dma.vmem_to_hbm [thread:$0]  %s47_s24, 128, %s49_s29, [#allocation5]  }
   0xe   :  { %141 = dma.done.wait [#allocation5], 128  }
   0xf   :  { %142 = vsyncadd [#allocation5], 4294967168 }
  0x10   :  { %143 = dma.done.wait [#allocation6], 16  }
  0x11   :  { %144 = vsyncadd [#allocation6], 4294967280 }
  0x12   :  { %69 = sfence }
  0x13   :  { %70 = vsyncpa [#allocation4], 1 }
  0x14   :  { %71 = vsyncpa [#allocation5], 1 }
  0x15   :  { %72 = vsyncpa [#allocation6], 1 }

</bundles_post_ra>
